<compile_context>
chip_gen: v5e
topology: v5e:2x2
jax: 0.10.0
libtpu: 0.0.40
codegen_flags: <defaults>
</compile_context>

<pallas_src>
import functools
import math

import numpy as np
import jax
import jax.numpy as jnp
from jax.experimental import pallas as pl
from jax.experimental.pallas import tpu as pltpu


_INV_SQRT2 = 1.0 / math.sqrt(2.0)
_VMEM_LIMIT_BYTES = 48 * 1024 * 1024    # leaves >=16 MiB compiler headroom on v7x (64 MiB)
_VMEM_BUDGET_BYTES = 36 * 1024 * 1024   # explicit-footprint target inside that limit


def _gelu_exact(x):
    # nn.GELU() default (approximate='none'): 0.5*x*(1+erf(x/sqrt(2)))
    return 0.5 * x * (1.0 + jax.lax.erf(x * _INV_SQRT2))


def _dot(a, b, compute_dtype):
    prec = (jax.lax.Precision.HIGHEST
            if compute_dtype == np.dtype(jnp.float32) else None)
    return jnp.dot(a, b, preferred_element_type=jnp.float32, precision=prec)


# --------------------------------------------------------------------------- kernels
def _mlp_resident_kernel(x_ref, wfc_ref, bfc_ref, wproj_ref, bproj_ref, o_ref,
                         *scratch, compute_dtype, n_chunks, tn, acc_in_out):
    """Weights fully resident in VMEM; grid is 1-D over row tiles."""
    si = 0
    if x_ref.dtype != compute_dtype:
        xb_ref = scratch[si]; si += 1
        xb_ref[...] = x_ref[...].astype(compute_dtype)   # cast once per row tile
        x_src = xb_ref
    else:
        x_src = x_ref

    acc_ref = o_ref if acc_in_out else scratch[si]
    # Initialize the (resident) accumulator with the projection bias.
    acc_ref[...] = jnp.broadcast_to(bproj_ref[...], acc_ref.shape)

    for c in range(n_chunks):          # short static loop over 4H chunks
        lo = c * tn
        h = _dot(x_src[...], wfc_ref[:, lo:lo + tn], compute_dtype)
        h = _gelu_exact(h + bfc_ref[:, lo:lo + tn])
        acc_ref[...] += _dot(h.astype(compute_dtype),
                             wproj_ref[lo:lo + tn, :], compute_dtype)

    if not acc_in_out:
        o_ref[...] = acc_ref[...].astype(o_ref.dtype)


def _mlp_tiled_kernel(x_ref, wfc_ref, bfc_ref, wproj_ref, bproj_ref, o_ref,
                      *scratch, compute_dtype, acc_in_out):
    """2-D grid: rows ("parallel") x 4H chunks ("arbitrary", last)."""
    n = pl.program_id(1)
    si = 0
    if x_ref.dtype != compute_dtype:
        xb_ref = scratch[si]; si += 1

        @pl.when(n == 0)               # cast cached across the reduction axis
        def _():
            xb_ref[...] = x_ref[...].astype(compute_dtype)

        xb = xb_ref[...]
    else:
        xb = x_ref[...]

    acc_ref = o_ref if acc_in_out else scratch[si]

    @pl.when(n == 0)
    def _():
        acc_ref[...] = jnp.broadcast_to(bproj_ref[...], acc_ref.shape)

    h = _dot(xb, wfc_ref[...], compute_dtype)
    h = _gelu_exact(h + bfc_ref[...])
    acc_ref[...] += _dot(h.astype(compute_dtype), wproj_ref[...], compute_dtype)

    if not acc_in_out:
        @pl.when(n == pl.num_programs(1) - 1)
        def _():
            o_ref[...] = acc_ref[...].astype(o_ref.dtype)


# --------------------------------------------------------------------------- helpers
def _round_up(a, b):
    return (a + b - 1) // b * b


def _cdiv(a, b):
    return (a + b - 1) // b


def _pick_tn(h4p, tn_max):
    """Largest multiple of 128 <= tn_max that divides h4p (h4p % 128 == 0)."""
    cand = max(128, min(tn_max, h4p) // 128 * 128)
    while cand > 128 and h4p % cand != 0:
        cand -= 128
    return cand


def _device_kind():
    try:
        return jax.devices()[0].device_kind.lower()
    except Exception:
        return ""


def _default_tm():
    kind = _device_kind()
    if "v5 lite" in kind or "v5e" in kind or "v5lite" in kind:
        return 256      # v5e: ~roofline already; bigger tiles only burn VMEM
    return 1024         # v6e / v7x: need tm >= ~700 to be MXU-bound on weight streaming


def _min_row_tiles():
    kind = _device_kind()
    # v7x has 2 TensorCores; make sure the "parallel" row axis has >= 2 tiles.
    return 2 if ("v7" in kind or "tpu7" in kind) else 1


def _vmem_footprint(tm, tn, H, H4p, x_bytes, out_bytes, w_bytes,
                    resident, need_xb, need_acc):
    f = 2 * tm * H * x_bytes              # x tile, double buffered
    f += 2 * tm * H * out_bytes           # out tile, double buffered
    if need_xb:
        f += tm * H * w_bytes             # cached compute-dtype copy of x
    if need_acc:
        f += tm * H * 4                   # f32 accumulator scratch
    f += tm * tn * (4 + w_bytes)          # live intermediate h (+ its cast)
    if resident:
        f += (H * H4p + H4p * H) * w_bytes + (H4p + H) * 4   # whole weights + biases
        f += 2 * H * tn * w_bytes                             # weight slices as values
    else:
        f += 2 * (H * tn + tn * H) * w_bytes                  # double-buffered chunks
        f += 2 * (tn + H) * 4                                  # bias blocks
    return f


# --------------------------------------------------------------------------- wrapper
def gpt2_mlp(x, w_fc, b_fc, w_proj, b_proj, *, tm=None, tn=1024,
             compute_dtype=jnp.bfloat16, force_tiled=False):
    """Fused GPT2MLP forward:  GELU(x @ w_fc + b_fc) @ w_proj + b_proj.

    x: [B, T, H];  w_fc: [H, 4H];  w_proj: [4H, H]   ([in, out] layout, i.e.
    transposed w.r.t. torch nn.Linear's stored [out, in] weight).
    compute_dtype: MXU operand dtype (bf16 fast path, f32 exact path); accumulation
    and biases are always f32.  Dropout is identity (eval/inference).
    """
    B, T, H = x.shape
    H4 = w_fc.shape[1]
    rows = B * T

    compute_dtype = np.dtype(compute_dtype)
    out_dtype = x.dtype
    x_bytes = np.dtype(x.dtype).itemsize
    out_bytes = np.dtype(out_dtype).itemsize
    w_bytes = compute_dtype.itemsize

    need_xb = np.dtype(x.dtype) != compute_dtype
    acc_in_out = np.dtype(out_dtype) == np.dtype(jnp.float32)

    # ---- tile / path selection ------------------------------------------------
    H4p = _round_up(H4, 128)
    tn_req = max(128, int(tn))
    tn_tiled = _pick_tn(H4p, tn_req)
    tn_res = _pick_tn(H4p, min(tn_req, 512))   # in-kernel chunk: smaller working set

    if tm is None:
        tm = _default_tm()
    tm = max(8, _round_up(int(tm), 8))

    tm_cap = _round_up(rows, 8)
    if _min_row_tiles() > 1 and rows >= 16:
        tm_cap = min(tm_cap, _round_up(_cdiv(rows, _min_row_tiles()), 8))
    tm0 = min(tm, tm_cap)

    def fp(tm_, tn_, resident):
        return _vmem_footprint(tm_, tn_, H, H4p, x_bytes, out_bytes, w_bytes,
                               resident, need_xb, not acc_in_out)

    tm_r = tm0
    while tm_r > 256 and fp(tm_r, tn_res, True) > _VMEM_BUDGET_BYTES:
        tm_r = max(256, tm_r - 128)
    use_resident = (not force_tiled) and fp(tm_r, tn_res, True) <= _VMEM_BUDGET_BYTES

    if use_resident:
        tm_eff, tn_eff = tm_r, tn_res
    else:
        tm_eff, tn_eff = tm0, tn_tiled
        while tm_eff > 128 and fp(tm_eff, tn_eff, False) > _VMEM_BUDGET_BYTES:
            tm_eff = max(128, tm_eff - 128)
        while tn_eff > 128 and fp(tm_eff, tn_eff, False) > _VMEM_BUDGET_BYTES:
            tn_eff = _pick_tn(H4p, tn_eff - 128)

    rows_p = _round_up(rows, tm_eff)
    n_row_tiles = rows_p // tm_eff

    # ---- operand preparation ----------------------------------------------------
    x2 = x.reshape(rows, H)
    if rows_p != rows:
        x2 = jnp.pad(x2, ((0, rows_p - rows), (0, 0)))

    wfc_c, wproj_c, bfc1 = w_fc, w_proj, b_fc
    if H4p != H4:  # zero-pad 4H to a lane multiple; zero Wproj rows keep it exact
        pad = H4p - H4
        wfc_c = jnp.pad(wfc_c, ((0, 0), (0, pad)))
        wproj_c = jnp.pad(wproj_c, ((0, pad), (0, 0)))
        bfc1 = jnp.pad(bfc1, (0, pad))
    wfc_c = wfc_c.astype(compute_dtype)
    wproj_c = wproj_c.astype(compute_dtype)
    bfc2 = bfc1.reshape(1, H4p).astype(jnp.float32)
    bproj2 = b_proj.reshape(1, H).astype(jnp.float32)

    scratch = []
    if need_xb:
        scratch.append(pltpu.VMEM((tm_eff, H), compute_dtype))
    if not acc_in_out:
        scratch.append(pltpu.VMEM((tm_eff, H), jnp.float32))

    # ---- cost estimate (real weight traffic) --------------------------------------
    w_passes = 1 if use_resident else n_row_tiles
    cost = pl.CostEstimate(
        flops=4 * rows_p * H * H4p,
        transcendentals=rows_p * H4p,
        bytes_accessed=(rows_p * H * (x_bytes + out_bytes)
                        + w_passes * (2 * H * H4p * w_bytes + (H4p + H) * 4)),
    )

    # ---- specs / kernel -----------------------------------------------------------
    if use_resident:
        n_chunks = H4p // tn_eff
        kernel = functools.partial(_mlp_resident_kernel,
                                   compute_dtype=compute_dtype,
                                   n_chunks=n_chunks, tn=tn_eff,
                                   acc_in_out=acc_in_out)
        grid = (n_row_tiles,)
        in_specs = [
            pl.BlockSpec((tm_eff, H), lambda i: (i, 0)),                  # x row tile
            pl.BlockSpec(memory_space=pltpu.MemorySpace.VMEM),            # Wfc (whole)
            pl.BlockSpec(memory_space=pltpu.MemorySpace.VMEM),            # bfc
            pl.BlockSpec(memory_space=pltpu.MemorySpace.VMEM),            # Wproj (whole)
            pl.BlockSpec(memory_space=pltpu.MemorySpace.VMEM),            # bproj
        ]
        out_specs = pl.BlockSpec((tm_eff, H), lambda i: (i, 0))
        dims = ("parallel",)
    else:
        kernel = functools.partial(_mlp_tiled_kernel,
                                   compute_dtype=compute_dtype,
                                   acc_in_out=acc_in_out)
        grid = (n_row_tiles, H4p // tn_eff)
        in_specs = [
            pl.BlockSpec((tm_eff, H), lambda i, n: (i, 0)),   # x row tile (DMA once/row tile)
            pl.BlockSpec((H, tn_eff), lambda i, n: (0, n)),   # Wfc 4H-chunk
            pl.BlockSpec((1, tn_eff), lambda i, n: (0, n)),   # bfc chunk
            pl.BlockSpec((tn_eff, H), lambda i, n: (n, 0)),   # Wproj chunk
            pl.BlockSpec((1, H), lambda i, n: (0, 0)),        # bproj
        ]
        out_specs = pl.BlockSpec((tm_eff, H), lambda i, n: (i, 0))
        dims = ("parallel", "arbitrary")

    out = pl.pallas_call(
        kernel,
        out_shape=jax.ShapeDtypeStruct((rows_p, H), out_dtype),
        grid_spec=pltpu.PrefetchScalarGridSpec(
            num_scalar_prefetch=0,
            grid=grid,
            in_specs=in_specs,
            out_specs=out_specs,
            scratch_shapes=scratch,
        ),
        compiler_params=pltpu.CompilerParams(
            dimension_semantics=dims,
            vmem_limit_bytes=_VMEM_LIMIT_BYTES,
        ),
        cost_estimate=cost,
    )(x2, wfc_c, bfc2, wproj_c, bproj2)

    if rows_p != rows:
        out = out[:rows]
    return out.reshape(B, T, H)


# --------------------------------------------------------------------------- demo
if __name__ == "__main__":
    def ref_mlp(x, w_fc, b_fc, w_proj, b_proj):
        xf = x.astype(jnp.float32)
        h = xf.reshape(-1, x.shape[-1]) @ w_fc + b_fc
        h = 0.5 * h * (1.0 + jax.lax.erf(h / math.sqrt(2.0)))
        y = h @ w_proj + b_proj
        return y.reshape(xf.shape)

    # ---- Test 1: tiny GPT-2-style MLP (resident-weights path) -----------------
    B, T, H = 2, 8, 32
    H4 = 4 * H
    key = jax.random.PRNGKey(0)
    kx, k1, k2, k3, k4 = jax.random.split(key, 5)

    x = jax.random.normal(kx, (B, T, H), dtype=jnp.float32)
    bound_fc = 1.0 / math.sqrt(H)
    bound_pr = 1.0 / math.sqrt(H4)
    w_fc = jax.random.uniform(k1, (H, H4), jnp.float32, -bound_fc, bound_fc)
    b_fc = jax.random.uniform(k2, (H4,), jnp.float32, -bound_fc, bound_fc)
    w_proj = jax.random.uniform(k3, (H4, H), jnp.float32, -bound_pr, bound_pr)
    b_proj = jax.random.uniform(k4, (H,), jnp.float32, -bound_pr, bound_pr)

    y_ref = ref_mlp(x, w_fc, b_fc, w_proj, b_proj)

    y_f32 = jax.block_until_ready(
        gpt2_mlp(x, w_fc, b_fc, w_proj, b_proj, compute_dtype=jnp.float32))
    assert jnp.allclose(y_f32, y_ref, atol=1e-4, rtol=1e-4), "f32 resident path mismatch"

    y_bf16 = jax.block_until_ready(
        gpt2_mlp(x, w_fc, b_fc, w_proj, b_proj, compute_dtype=jnp.bfloat16))
    assert jnp.allclose(y_bf16, y_ref, atol=2e-2, rtol=2e-2), "bf16 resident path mismatch"

    # bf16 activations in / bf16 out (exercises the f32 accumulator scratch)
    x_b = x.astype(jnp.bfloat16)
    y_bb = jax.block_until_ready(
        gpt2_mlp(x_b, w_fc, b_fc, w_proj, b_proj, compute_dtype=jnp.bfloat16))
    y_ref_b = ref_mlp(x_b, w_fc, b_fc, w_proj, b_proj)
    assert jnp.allclose(y_bb.astype(jnp.float32), y_ref_b, atol=5e-2, rtol=5e-2), \
        "bf16-in/bf16-out path mismatch"

    # ---- Test 2: forced tiled / reduction-grid fallback path -------------------
    B2, T2, H2 = 4, 32, 128
    H42 = 4 * H2
    k5, k6, k7, k8, k9 = jax.random.split(jax.random.PRNGKey(1), 5)
    x2 = jax.random.normal(k5, (B2, T2, H2), dtype=jnp.float32)
    bf2 = 1.0 / math.sqrt(H2)
    bp2 = 1.0 / math.sqrt(H42)
    w_fc2 = jax.random.uniform(k6, (H2, H42), jnp.float32, -bf2, bf2)
    b_fc2 = jax.random.uniform(k7, (H42,), jnp.float32, -bf2, bf2)
    w_proj2 = jax.random.uniform(k8, (H42, H2), jnp.float32, -bp2, bp2)
    b_proj2 = jax.random.uniform(k9, (H2,), jnp.float32, -bp2, bp2)

    y2_ref = ref_mlp(x2, w_fc2, b_fc2, w_proj2, b_proj2)

    y2_f32 = jax.block_until_ready(
        gpt2_mlp(x2, w_fc2, b_fc2, w_proj2, b_proj2,
                 tm=64, tn=256, compute_dtype=jnp.float32, force_tiled=True))
    assert jnp.allclose(y2_f32, y2_ref, atol=1e-4, rtol=1e-4), "f32 tiled path mismatch"

    y2_bf16 = jax.block_until_ready(
        gpt2_mlp(x2, w_fc2, b_fc2, w_proj2, b_proj2,
                 tm=64, tn=256, compute_dtype=jnp.bfloat16, force_tiled=True))
    assert jnp.allclose(y2_bf16, y2_ref, atol=2e-2, rtol=2e-2), "bf16 tiled path mismatch"

    print("KERNEL_OK")
</pallas_src>

<mosaic_0001>
module attributes {stable_mosaic.version = 11 : i64} {
  func.func @_mlp_resident_kernel(%arg0: i32, %arg1: memref<16x32xf32, #tpu.memory_space<vmem>>, %arg2: memref<32x128xf32, #tpu.memory_space<vmem>>, %arg3: memref<1x128xf32, #tpu.memory_space<vmem>>, %arg4: memref<128x32xf32, #tpu.memory_space<vmem>>, %arg5: memref<1x32xf32, #tpu.memory_space<vmem>>, %arg6: memref<16x32xf32, #tpu.memory_space<vmem>>) attributes {dimension_semantics = [#tpu.dimension_semantics<parallel>], iteration_bounds = array<i64: 1>, scalar_prefetch = 0 : i64, scratch_operands = 0 : i64, tpu.core_type = #tpu.core_type<tc>, window_params = [{transform_indices = @transform_0, window_bounds = array<i64: 16, 32>}, {pipeline_mode = #tpu.pipeline_mode<synchronous>, transform_indices = @transform_1, window_bounds = array<i64: 32, 128>}, {pipeline_mode = #tpu.pipeline_mode<synchronous>, transform_indices = @transform_2, window_bounds = array<i64: 1, 128>}, {pipeline_mode = #tpu.pipeline_mode<synchronous>, transform_indices = @transform_3, window_bounds = array<i64: 128, 32>}, {pipeline_mode = #tpu.pipeline_mode<synchronous>, transform_indices = @transform_4, window_bounds = array<i64: 1, 32>}, {transform_indices = @transform_5, window_bounds = array<i64: 16, 32>}]} {
    %c0 = arith.constant 0 : index
    %c0_0 = arith.constant 0 : index
    %0 = vector.load %arg5[%c0, %c0_0] : memref<1x32xf32, #tpu.memory_space<vmem>>, vector<1x32xf32>
    %1 = vector.shape_cast %0 : vector<1x32xf32> to vector<1x32xf32>
    %2 = vector.broadcast %1 : vector<1x32xf32> to vector<16x32xf32>
    %c0_1 = arith.constant 0 : index
    %c0_2 = arith.constant 0 : index
    %3 = vector.load %arg6[%c0_1, %c0_2] : memref<16x32xf32, #tpu.memory_space<vmem>>, vector<16x32xf32>
    tpu.vector_store %arg6[%c0_1, %c0_2], %2 {strides = array<i32>} : memref<16x32xf32, #tpu.memory_space<vmem>>, vector<16x32xf32>,
    %c0_3 = arith.constant 0 : index
    %c0_4 = arith.constant 0 : index
    %4 = vector.load %arg1[%c0_3, %c0_4] : memref<16x32xf32, #tpu.memory_space<vmem>>, vector<16x32xf32>
    %c0_5 = arith.constant 0 : index
    %c0_6 = arith.constant 0 : index
    %5 = vector.load %arg2[%c0_5, %c0_6] : memref<32x128xf32, #tpu.memory_space<vmem>>, vector<32x128xf32>
    %cst = arith.constant dense<0.000000e+00> : vector<16x128xf32>
    %6 = tpu.matmul %4, %5, %cst {dimension_numbers = #tpu.dot_dimension_numbers<[1], [0], [0], [1], [0, 0, 1, 1], [], []>, precision = #tpu.contract_precision<fp32>} : vector<16x32xf32>, vector<32x128xf32>, vector<16x128xf32> -> vector<16x128xf32>
    %c0_7 = arith.constant 0 : index
    %c0_8 = arith.constant 0 : index
    %7 = vector.load %arg3[%c0_7, %c0_8] : memref<1x128xf32, #tpu.memory_space<vmem>>, vector<1x128xf32>
    %8 = vector.broadcast %7 : vector<1x128xf32> to vector<16x128xf32>
    %9 = arith.addf %6, %8 : vector<16x128xf32>
    %cst_9 = arith.constant 5.000000e-01 : f32
    %10 = vector.broadcast %cst_9 : f32 to vector<16x128xf32>
    %11 = arith.mulf %10, %9 : vector<16x128xf32>
    %cst_10 = arith.constant 0.707106769 : f32
    %12 = vector.broadcast %cst_10 : f32 to vector<16x128xf32>
    %13 = arith.mulf %9, %12 : vector<16x128xf32>
    %14 = math.erf %13 : vector<16x128xf32>
    %cst_11 = arith.constant 1.000000e+00 : f32
    %15 = vector.broadcast %cst_11 : f32 to vector<16x128xf32>
    %16 = arith.addf %15, %14 : vector<16x128xf32>
    %17 = arith.mulf %11, %16 : vector<16x128xf32>
    %c0_12 = arith.constant 0 : index
    %c0_13 = arith.constant 0 : index
    %18 = vector.load %arg6[%c0_12, %c0_13] : memref<16x32xf32, #tpu.memory_space<vmem>>, vector<16x32xf32>
    %c0_14 = arith.constant 0 : index
    %c0_15 = arith.constant 0 : index
    %19 = vector.load %arg4[%c0_14, %c0_15] : memref<128x32xf32, #tpu.memory_space<vmem>>, vector<128x32xf32>
    %cst_16 = arith.constant dense<0.000000e+00> : vector<16x32xf32>
    %20 = tpu.matmul %17, %19, %cst_16 {dimension_numbers = #tpu.dot_dimension_numbers<[1], [0], [0], [1], [0, 0, 1, 1], [], []>, precision = #tpu.contract_precision<fp32>} : vector<16x128xf32>, vector<128x32xf32>, vector<16x32xf32> -> vector<16x32xf32>
    %21 = arith.addf %18, %20 : vector<16x32xf32>
    %c0_17 = arith.constant 0 : index
    %c0_18 = arith.constant 0 : index
    %22 = vector.load %arg6[%c0_17, %c0_18] : memref<16x32xf32, #tpu.memory_space<vmem>>, vector<16x32xf32>
    tpu.vector_store %arg6[%c0_17, %c0_18], %21 {strides = array<i32>} : memref<16x32xf32, #tpu.memory_space<vmem>>, vector<16x32xf32>,
    return
  }
  func.func @transform_0(%arg0: i32) -> (i32, i32) {
    %c0_i32 = arith.constant 0 : i32
    %c0_i32_0 = arith.constant 0 : i32
    return %arg0, %c0_i32 : i32, i32
  }
  func.func @transform_1(%arg0: i32) -> (i32, i32) {
    %c0_i32 = arith.constant 0 : i32
    %c0_i32_0 = arith.constant 0 : i32
    %c0_i32_1 = arith.constant 0 : i32
    return %c0_i32, %c0_i32_0 : i32, i32
  }
  func.func @transform_2(%arg0: i32) -> (i32, i32) {
    %c0_i32 = arith.constant 0 : i32
    %c0_i32_0 = arith.constant 0 : i32
    %c0_i32_1 = arith.constant 0 : i32
    return %c0_i32, %c0_i32_0 : i32, i32
  }
  func.func @transform_3(%arg0: i32) -> (i32, i32) {
    %c0_i32 = arith.constant 0 : i32
    %c0_i32_0 = arith.constant 0 : i32
    %c0_i32_1 = arith.constant 0 : i32
    return %c0_i32, %c0_i32_0 : i32, i32
  }
  func.func @transform_4(%arg0: i32) -> (i32, i32) {
    %c0_i32 = arith.constant 0 : i32
    %c0_i32_0 = arith.constant 0 : i32
    %c0_i32_1 = arith.constant 0 : i32
    return %c0_i32, %c0_i32_0 : i32, i32
  }
  func.func @transform_5(%arg0: i32) -> (i32, i32) {
    %c0_i32 = arith.constant 0 : i32
    %c0_i32_0 = arith.constant 0 : i32
    return %arg0, %c0_i32 : i32, i32
  }
}

</mosaic_0001>

<bundles_post_ra>
// kernel: tpu_custom_call.1
= control target key start
LH: loop header
LB: loop body
LE: loop exit
PB: predicated region body
PF: predicated region fallthrough
CT: control target
= control target key end

     0   :  { %vm25_vm0 = vcmask 261120   ;;  %s1197_s0 = inlined_call_operand.vmem [shape: f32[16,32], index: 0, kind: input, shape index: {}]   ;;  %s1198_s1 = inlined_call_operand.vmem [shape: f32[32,128], index: 1, kind: input, shape index: {}]   ;;  %s1199_s2 = inlined_call_operand.vmem [shape: f32[1,128], index: 2, kind: input, shape index: {}]   ;;  %s1200_s3 = inlined_call_operand.vmem [shape: f32[128,32], index: 3, kind: input, shape index: {}]   ;;  %s1201_s4 = inlined_call_operand.vmem [shape: f32[1,32], index: 4, kind: input, shape index: {}]   ;;  %s1202_s5 = inlined_call_operand.hbm [shape: f32[16,32], index: 5, kind: output, shape index: {}]  }
   0x1   :  { %v33_v0 = vld [vmem:[%s1198_s1 + $0x18] sm:$0xff]  ;;  %v32_v1 = vld [vmem:[%s1198_s1 + $0x10] sm:$0xff]  ;;  %v31_v2 = vld [vmem:[%s1198_s1 + $0x8] sm:$0xff] }
   0x2   :  { %v56_v3 = vand.u32 4294901760, %v33_v0  ;;  %v58_v4 = vand.u32 4294901760, %v32_v1  ;;  %v60_v5 = vand.u32 4294901760, %v31_v2  ;;  %v30_v6 = vld [vmem:[%s1198_s1] sm:$0xff]  ;;  %v29_v8 = vld [vmem:[%s1197_s0 + $0x8] sm:$0xff] }
   0x3   :  { %v28_v7 = vld [vmem:[%s1197_s0] sm:$0xff]  ;;  %v62_v9 = vand.u32 4294901760, %v30_v6  ;;  %v42_v11 = vsel %vm25_vm0, %v29_v8, 0 }
   0x4   :  { %v39_v10 = vsel %vm25_vm0, %v28_v7, 0  ;;  %57 = vmatpush.msra.mxu0 %v56_v3  ;;  %v94_v12 = vsub.f32 %v33_v0, %v56_v3  ;;  %v100_v13 = vsub.f32 %v32_v1, %v58_v4  ;;  %174 = vmatpush.msra.mxu3 %v56_v3  ;;  %v106_v14 = vsub.f32 %v31_v2, %v60_v5 }
   0x5   :  { %v64_v15 = vand.u32 4294901760, %v39_v10 }
   0x6   :  { %10 = vsyncpa [#allocation3], 0  ;;  %v112_v16 = vsub.f32 %v30_v6, %v62_v9  ;;  %v72_v17 = vand.u32 4294901760, %v42_v11  ;;  %59 = vmatpush.msra.mxu0 %v58_v4  ;;  %140 = vmatpush.msra.mxu2 %v94_v12  ;;  %v95_v18 = vand.u32 4294901760, %v94_v12  ;;  %v101_v20 = vand.u32 4294901760, %v100_v13  ;;  %v365_v38 = vld [vmem:[%s1200_s3 + $0x78] sm:$0xff] }
   0x7   :  { %v65_v19 = vsub.f32 %v39_v10, %v64_v15  ;;  %v107_v21 = vand.u32 4294901760, %v106_v14  ;;  %176 = vmatpush.msra.mxu3 %v58_v4  ;;  %v853_v39 = vand.u32 4294901760, %v365_v38  ;;  %v364_v40 = vld [vmem:[%s1200_s3 + $0x70] sm:$0xff]  ;;  %v363_v43 = vld [vmem:[%s1200_s3 + $0x68] sm:$0xff]  ;;  %v362_v47 = vld [vmem:[%s1200_s3 + $0x60] sm:$0xff]  ;;  %s748_s13 = sshll.u32 %s1202_s5, 4  ;;  %s749_s13 = int_to_ptr.hbm [resolvable:$true] %s748_s13 }
   0x8   :  { %v113_v22 = vand.u32 4294901760, %v112_v16  ;;  %v73_v23 = vsub.f32 %v42_v11, %v72_v17  ;;  %61 = vmatpush.msra.mxu0 %v60_v5  ;;  %143 = vmatpush.msra.mxu2 %v100_v13  ;;  %v96_v24 = vsub.f32 %v94_v12, %v95_v18  ;;  %v102_v26 = vsub.f32 %v100_v13, %v101_v20  ;;  %v361_v52 = vld [vmem:[%s1200_s3 + $0x58] sm:$0xff]  ;;  %v360_v59 = vld [vmem:[%s1200_s3 + $0x50] sm:$0xff]  ;;  %v918_v63 = vld [vmem:[%s1199_s2] ss:$0 sm:$0xff]  ;;  %s798_s14 = smov 128  }
   0x9   :  { %v66_v25 = vand.u32 4294901760, %v65_v19  ;;  %v108_v27 = vsub.f32 %v106_v14, %v107_v21  ;;  %178 = vmatpush.msra.mxu3 %v60_v5  ;;  %v859_v41 = vsub.f32 %v365_v38, %v853_v39  ;;  %v861_v42 = vand.u32 4294901760, %v364_v40  ;;  %v359_v2 = vld [vmem:[%s1200_s3 + $0x48] sm:$0xff]  ;;  %v358_v8 = vld [vmem:[%s1200_s3 + $0x40] sm:$0xff]  ;;  %s799_s15 = smov 8  }
   0xa   :  { %v114_v28 = vsub.f32 %v112_v16, %v113_v22  ;;  %63 = vmatpush.msra.mxu0 %v62_v9  ;;  %v97_v29 = vand.u32 4294901760, %v96_v24  ;;  %146 = vmatpush.msra.mxu2 %v106_v14  ;;  %v103_v31 = vand.u32 4294901760, %v102_v26  ;;  %v74_v32 = vand.u32 4294901760, %v73_v23 }
   0xb   :  { %v67_v30 = vsub.f32 %v65_v19, %v66_v25  ;;  %180 = vmatpush.msra.mxu3 %v62_v9  ;;  %v109_v34 = vand.u32 4294901760, %v108_v27  ;;  %v417_v44 = vand.u32 4294901760, %v859_v41  ;;  %v870_v45 = vsub.f32 %v364_v40, %v861_v42 }
   0xc   :  { %209 = vmatpush.msrb.mxu0 %v95_v18  ;;  %98 = vmatpush.msra.mxu1 %v97_v29  ;;  %v115_v35 = vand.u32 4294901760, %v114_v28  ;;  %v75_v36 = vsub.f32 %v73_v23, %v74_v32  ;;  %v872_v46 = vand.u32 4294901760, %v363_v43  ;;  %v887_v51 = vand.u32 4294901760, %v362_v47 }
   0xd   :  { %v68_v33 = vand.u32 4294901760, %v67_v30  ;;  %149 = vmatpush.msra.mxu2 %v112_v16  ;;  %184 = vmatmul.f32.vlgmr.msra.gmra.mxu3 %v66_v25  ;;  %v418_v48 = vsub.f32 %v859_v41, %v417_v44  ;;  %v423_v49 = vand.u32 4294901760, %v870_v45  ;;  %v904_v58 = vand.u32 4294901760, %v361_v52  ;;  %v357_v16 = vld [vmem:[%s1200_s3 + $0x38] sm:$0xff] }
   0xe   :  { %152 = vmatmul.f32.vlgmr.msra.gmra.mxu2 %v65_v19  ;;  %104 = vmatpush.msra.mxu1 %v103_v31  ;;  %v76_v37 = vand.u32 4294901760, %v75_v36  ;;  %v885_v50 = vsub.f32 %v363_v43, %v872_v46  ;;  %v900_v56 = vsub.f32 %v362_v47, %v887_v51  ;;  %v923_v1 = vand.u32 4294901760, %v360_v59  ;;  %v355_v31 = vld [vmem:[%s1200_s3 + $0x28] sm:$0xff] }
   0xf   :  { %69 = vmatmul.f32.vlgmr.msra.gmra.mxu0 %v68_v33  ;;  %367 = vmatpush.msrb.mxu2 %v853_v39  ;;  %v419_v53 = vand.u32 4294901760, %v418_v48  ;;  %v424_v54 = vsub.f32 %v870_v45, %v423_v49  ;;  %v921_v0 = vsub.f32 %v361_v52, %v904_v58  ;;  %v947_v12 = vand.u32 4294901760, %v358_v8 }
  0x10   :  { %213 = vmatpush.msrb.mxu0 %v101_v20  ;;  %110 = vmatpush.msra.mxu1 %v109_v34  ;;  %v429_v55 = vand.u32 4294901760, %v885_v50  ;;  %v435_v62 = vand.u32 4294901760, %v900_v56  ;;  %v937_v7 = vsub.f32 %v360_v59, %v923_v1  ;;  %v964_v19 = vand.u32 4294901760, %v357_v16  ;;  %v353_v59 = vld [vmem:[%s1200_s3 + $0x18] sm:$0xff] }
  0x11   :  { %369 = vmatpush.msrb.mxu2 %v861_v42  ;;  %420 = vmatpush.msrb.mxu3 %v419_v53  ;;  %v425_v60 = vand.u32 4294901760, %v424_v54  ;;  %v441_v6 = vand.u32 4294901760, %v921_v0  ;;  %v962_v18 = vsub.f32 %v358_v8, %v947_v12  ;;  %v352_v8 = vld [vmem:[%s1200_s3 + $0x10] sm:$0xff] }
  0x12   :  { %217 = vmatpush.msrb.mxu0 %v107_v21  ;;  %116 = vmatpush.msra.mxu1 %v115_v35  ;;  %v430_v61 = vsub.f32 %v885_v50, %v429_v55  ;;  %v980_v27 = vsub.f32 %v357_v16, %v964_v19  ;;  %v993_v35 = vand.u32 4294901760, %v355_v31 }
  0x13   :  { %118 = vmatmul.f32.vlgmr.msra.gmra.mxu1 %v64_v15  ;;  %371 = vmatpush.msrb.mxu2 %v872_v46  ;;  %v442_v14 = vsub.f32 %v921_v0, %v441_v6  ;;  %v459_v26 = vand.u32 4294901760, %v962_v18 }
  0x14   :  { %221 = vmatpush.msrb.mxu0 %v113_v22  ;;  %244 = vmatpush.msrb.mxu1 %v56_v3  ;;  %v431_v3 = vand.u32 4294901760, %v430_v61  ;;  %v465_v34 = vand.u32 4294901760, %v980_v27  ;;  %v1008_v48 = vsub.f32 %v355_v31, %v993_v35 }
  0x15   :  { %190 = vmatmul.f32.gmra.mxu3 %v74_v32  ;;  %373 = vmatpush.msrb.mxu2 %v887_v51  ;;  %v443_v21 = vand.u32 4294901760, %v442_v14  ;;  %v460_v33 = vsub.f32 %v962_v18, %v459_v26 }
  0x16   :  { %157 = vmatmul.f32.gmra.mxu2 %v73_v23  ;;  %246 = vmatpush.msrb.mxu1 %v58_v4  ;;  %v436_v4 = vsub.f32 %v900_v56, %v435_v62  ;;  %v356_v23 = vld [vmem:[%s1200_s3 + $0x30] sm:$0xff]  ;;  %v466_v47 = vsub.f32 %v980_v27, %v465_v34  ;;  %v477_v61 = vand.u32 4294901760, %v1008_v48 }
  0x17   :  { %77 = vmatmul.f32.gmra.mxu0 %v76_v37  ;;  %375 = vmatpush.msrb.mxu2 %v904_v58  ;;  %v983_v30 = vand.u32 4294901760, %v356_v23  ;;  %v354_v37 = vld [vmem:[%s1200_s3 + $0x20] sm:$0xff]  ;;  %v461_v43 = vand.u32 4294901760, %v460_v33 }
  0x18   :  { %248 = vmatpush.msrb.mxu1 %v60_v5  ;;  %522 = vmatpush.msra.mxu0 %v859_v41  ;;  %v933_v5 = vand.u32 4294901760, %v359_v2  ;;  %v437_v10 = vand.u32 4294901760, %v436_v4  ;;  %v1010_v52 = vand.u32 4294901760, %v354_v37  ;;  %v350_v33 = vld [vmem:[%s1200_s3] sm:$0xff] }
  0x19   :  { %426 = vmatpush.msrb.mxu3 %v425_v60  ;;  %377 = vmatpush.msrb.mxu2 %v923_v1  ;;  %v998_v36 = vsub.f32 %v356_v23, %v983_v30  ;;  %v467_v60 = vand.u32 4294901760, %v466_v47  ;;  %v1071_v47 = vand.u32 4294901760, %v350_v33 }
  0x1a   :  { %250 = vmatpush.msrb.mxu1 %v62_v9  ;;  %525 = vmatpush.msra.mxu0 %v870_v45  ;;  %v945_v11 = vsub.f32 %v359_v2, %v933_v5  ;;  %v1022_v2 = vsub.f32 %v354_v37, %v1010_v52 }
  0x1b   :  { %122 = vmatmul.f32.gmra.mxu1 %v72_v17  ;;  %432 = vmatpush.msrb.mxu3 %v431_v3  ;;  %v1024_v3 = vand.u32 4294901760, %v353_v59 }
  0x1c   :  { %580 = vmatpush.msra.mxu1 %v853_v39  ;;  %528 = vmatpush.msra.mxu0 %v885_v50 }
  0x1d   :  { %379 = vmatpush.msrb.mxu2 %v933_v5  ;;  %438 = vmatpush.msrb.mxu3 %v437_v10  ;;  %v483_v10 = vand.u32 4294901760, %v1022_v2 }
  0x1e   :  { %582 = vmatpush.msra.mxu1 %v861_v42  ;;  %531 = vmatpush.msra.mxu0 %v900_v56 }
  0x1f   :  { %223 = vmatmul.f32.vlgmr.msrb.gmra.mxu0 %v64_v15  ;;  %381 = vmatpush.msrb.mxu2 %v947_v12 }
  0x20   :  { %584 = vmatpush.msra.mxu1 %v872_v46  ;;  %534 = vmatpush.msra.mxu0 %v921_v0 }
  0x21   :  { %444 = vmatpush.msrb.mxu3 %v443_v21  ;;  %383 = vmatpush.msrb.mxu2 %v964_v19  ;;  %v1044_v21 = vand.u32 4294901760, %v352_v8 }
  0x22   :  { %586 = vmatpush.msra.mxu1 %v887_v51  ;;  %537 = vmatpush.msra.mxu0 %v937_v7 }
  0x23   :  { %252 = vmatmul.f32.vlgmr.msrb.gmra.mxu1 %v64_v15  ;;  %v447_v15 = vand.u32 4294901760, %v937_v7  ;;  %385 = vmatpush.msrb.mxu2 %v983_v30 }
  0x24   :  { %588 = vmatpush.msra.mxu1 %v904_v58  ;;  %540 = vmatpush.msra.mxu0 %v945_v11 }
  0x25   :  { %v448_v22 = vsub.f32 %v937_v7, %v447_v15  ;;  %387 = vmatpush.msrb.mxu2 %v993_v35 }
  0x26   :  { %590 = vmatpush.msra.mxu1 %v923_v1  ;;  %543 = vmatpush.msra.mxu0 %v962_v18 }
  0x27   :  { %227 = vmatmul.f32.gmra.mxu0 %v72_v17  ;;  %v449_v29 = vand.u32 4294901760, %v448_v22  ;;  %389 = vmatpush.msrb.mxu2 %v1010_v52  ;;  %v351_v22 = vld [vmem:[%s1200_s3 + $0x8] sm:$0xff] }
  0x28   :  { %592 = vmatpush.msra.mxu1 %v933_v5  ;;  %546 = vmatpush.msra.mxu0 %v980_v27 }
  0x29   :  { %450 = vmatpush.msrb.mxu3 %v449_v29  ;;  %391 = vmatpush.msrb.mxu2 %v1024_v3  ;;  %v1054_v29 = vand.u32 4294901760, %v351_v22 }
  0x2a   :  { %594 = vmatpush.msra.mxu1 %v947_v12  ;;  %549 = vmatpush.msra.mxu0 %v998_v36 }
  0x2b   :  { %256 = vmatmul.f32.gmra.mxu1 %v72_v17  ;;  %v453_v17 = vand.u32 4294901760, %v945_v11  ;;  %393 = vmatpush.msrb.mxu2 %v1044_v21 }
  0x2c   :  { %596 = vmatpush.msra.mxu1 %v964_v19  ;;  %552 = vmatpush.msra.mxu0 %v1008_v48 }
  0x2d   :  { %v454_v25 = vsub.f32 %v945_v11, %v453_v17  ;;  %395 = vmatpush.msrb.mxu2 %v1054_v29 }
  0x2e   :  { %598 = vmatpush.msra.mxu1 %v983_v30  ;;  %555 = vmatpush.msra.mxu0 %v1022_v2 }
  0x2f   :  { %v455_v32 = vand.u32 4294901760, %v454_v25  ;;  %v484_v25 = vsub.f32 %v1022_v2, %v483_v10  ;;  %397 = vmatpush.msrb.mxu2 %v1071_v47 }
  0x30   :  { %600 = vmatpush.msra.mxu1 %v993_v35 }
  0x31   :  { %456 = vmatpush.msrb.mxu3 %v455_v32  ;;  %v1059_v32 = vsub.f32 %v352_v8, %v1044_v21  ;;  %v1081_v8 = vsub.f32 %v350_v33, %v1071_v47  ;;  %627 = vmatpush.msra.mxu2 %v417_v44 }
  0x32   :  { %602 = vmatpush.msra.mxu1 %v1010_v52 }
  0x33   :  { %462 = vmatpush.msrb.mxu3 %v461_v43  ;;  %v1069_v43 = vsub.f32 %v351_v22, %v1054_v29  ;;  %v507_v22 = vand.u32 4294901760, %v1081_v8  ;;  %631 = vmatpush.msra.mxu2 %v423_v49 }
  0x34   :  { %604 = vmatpush.msra.mxu1 %v1024_v3 }
  0x35   :  { %468 = vmatpush.msrb.mxu3 %v467_v60  ;;  %v508_v33 = vsub.f32 %v1081_v8, %v507_v22  ;;  %635 = vmatpush.msra.mxu2 %v429_v55 }
  0x36   :  { %606 = vmatpush.msra.mxu1 %v1044_v21 }
  0x37   :  { %639 = vmatpush.msra.mxu2 %v435_v62 }
  0x38   :  { %608 = vmatpush.msra.mxu1 %v1054_v29 }
  0x39   :  { %643 = vmatpush.msra.mxu2 %v441_v6 }
  0x3a   :  { %610 = vmatpush.msra.mxu1 %v1071_v47 }
  0x3b   :  { %647 = vmatpush.msra.mxu2 %v447_v15 }
  0x3d   :  { %651 = vmatpush.msra.mxu2 %v453_v17 }
  0x3f   :  { %655 = vmatpush.msra.mxu2 %v459_v26 }
  0x41   :  { %659 = vmatpush.msra.mxu2 %v465_v34 }
  0x8c   :  { %v70_v57 = vpop.f32.mrf.mxu0 }
  0x8d   :  { %v71_v13 = vadd.f32 %v918_v63, %v70_v57  ;;  %v471_v57 = vand.u32 4294901760, %v998_v36 }
  0x8f   :  { %v472_v4 = vsub.f32 %v998_v36, %v471_v57  ;;  %663 = vmatpush.msra.mxu2 %v471_v57 }
  0x90   :  { %v119_v9 = vpop.f32.mrf.mxu1  ;;  %v185_v38 = vpop.f32.mrf.mxu3 }
  0x91   :  { %v153_v24 = vpop.f32.mrf.mxu2  ;;  %v120_v28 = vadd.f32 %v119_v9, %v71_v13  ;;  %v478_v9 = vsub.f32 %v1008_v48, %v477_v61  ;;  %v1040_v13 = vsub.f32 %v353_v59, %v1024_v3  ;;  %v495_v59 = vand.u32 4294901760, %v1059_v32  ;;  %667 = vmatpush.msra.mxu2 %v477_v61 }
  0x93   :  { %v154_v54 = vadd.f32 %v153_v24, %v120_v28  ;;  %v479_v24 = vand.u32 4294901760, %v478_v9  ;;  %v489_v28 = vand.u32 4294901760, %v1040_v13  ;;  %558 = vmatpush.msra.mxu0 %v1040_v13  ;;  %671 = vmatpush.msra.mxu2 %v483_v10 }
  0x94   :  { %v78_v20 = vpop.f32.mrf.mxu0 }
  0x95   :  { %v79_v53 = vadd.f32 %v918_v63, %v78_v20  ;;  %v186_v14 = vadd.f32 %v185_v38, %v154_v54  ;;  %v473_v20 = vand.u32 4294901760, %v472_v4  ;;  %v485_v38 = vand.u32 4294901760, %v484_v25  ;;  %561 = vmatpush.msra.mxu0 %v1059_v32  ;;  %675 = vmatpush.msra.mxu2 %v489_v28 }
  0x96   :  { %v501_v4 = vand.u32 4294901760, %v1069_v43 }
  0x97   :  { %474 = vmatpush.msrb.mxu3 %v473_v20  ;;  %564 = vmatpush.msra.mxu0 %v1069_v43 }
  0x98   :  { %v123_v40 = vpop.f32.mrf.mxu1  ;;  %v191_v60 = vpop.f32.mrf.mxu3  ;;  %v502_v20 = vsub.f32 %v1069_v43, %v501_v4  ;;  %679 = vmatpush.msra.mxu2 %v495_v59 }
  0x99   :  { %v124_v16 = vadd.f32 %v123_v40, %v79_v53  ;;  %v158_v23 = vpop.f32.mrf.mxu2  ;;  %v490_v40 = vsub.f32 %v1040_v13, %v489_v28  ;;  %480 = vmatpush.msrb.mxu3 %v479_v24  ;;  %567 = vmatpush.msra.mxu0 %v1081_v8 }
  0x9a   :  { %683 = vmatpush.msra.mxu2 %v501_v4 }
  0x9b   :  { %v159_v53 = vadd.f32 %v158_v23, %v124_v16  ;;  %486 = vmatpush.msrb.mxu3 %v485_v38  ;;  %v509_v38 = vand.u32 4294901760, %v508_v33 }
  0x9c   :  { %v224_v63 = vpop.f32.mrf.mxu0  ;;  %687 = vmatpush.msra.mxu2 %v507_v22 }
  0x9d   :  { %v225_v31 = vadd.f32 %v224_v63, %v186_v14  ;;  %v491_v63 = vand.u32 4294901760, %v490_v40  ;;  %v496_v14 = vsub.f32 %v1059_v32, %v495_v59  ;;  %v192_v23 = vadd.f32 %v191_v60, %v159_v53 }
  0x9f   :  { %492 = vmatpush.msrb.mxu3 %v491_v63  ;;  %v497_v25 = vand.u32 4294901760, %v496_v14 }
  0xa0   :  { %v253_v37 = vpop.f32.mrf.mxu1 }
  0xa1   :  { %v1075_v54 = vadd.f32 %v253_v37, %v225_v31  ;;  %v503_v31 = vand.u32 4294901760, %v502_v20  ;;  %498 = vmatpush.msrb.mxu3 %v497_v25 }
  0xa3   :  { %v1086_v9 = vmul.f32 0.70710677, %v1075_v54  ;;  %504 = vmatpush.msrb.mxu3 %v503_v31 }
  0xa4   :  { %v228_v16 = vpop.f32.mrf.mxu0 }
  0xa5   :  { %v264_v24 = vmul.f32 %v1086_v9, %v1086_v9  ;;  %v229_v44 = vadd.f32 %v228_v16, %v192_v23  ;;  %510 = vmatpush.msrb.mxu3 %v509_v38 }
  0xa7   :  { %v1108_v41 = vmin.f32 %v264_v24, 16.0  ;;  %698 = vmatpush.msra.mxu3 %v853_v39 }
  0xa8   :  { %v257_v37 = vpop.f32.mrf.mxu1 }
  0xa9   :  { %v266_v40 = vmul.f32 2.1237322e-06, %v1108_v41  ;;  %v277_v53 = vmul.f32 3.8918573e-05, %v1108_v41  ;;  %v1114_v60 = vadd.f32 %v257_v37, %v229_v44  ;;  %700 = vmatpush.msra.mxu3 %v861_v42 }
  0xab   :  { %v267_v45 = vadd.f32 0.00028619796, %v266_v40  ;;  %v278_v49 = vadd.f32 0.001143296, %v277_v53  ;;  %v1119_v63 = vmul.f32 0.70710677, %v1114_v60  ;;  %702 = vmatpush.msra.mxu3 %v872_v46 }
  0xad   :  { %v268_v50 = vmul.f32 %v267_v45, %v1108_v41  ;;  %v279_v55 = vmul.f32 %v278_v49, %v1108_v41  ;;  %v304_v14 = vmul.f32 %v1119_v63, %v1119_v63  ;;  %704 = vmatpush.msra.mxu3 %v887_v51 }
  0xaf   :  { %v280_v56 = vadd.f32 0.014752088, %v279_v55  ;;  %v269_v62 = vadd.f32 0.0036580483, %v268_v50  ;;  %v1131_v16 = vmin.f32 %v304_v14, 16.0  ;;  %706 = vmatpush.msra.mxu3 %v904_v58 }
  0xb1   :  { %v281_v39 = vmul.f32 %v280_v56, %v1108_v41  ;;  %v306_v0 = vmul.f32 2.1237322e-06, %v1131_v16  ;;  %v317_v6 = vmul.f32 3.8918573e-05, %v1131_v16  ;;  %v270_v7 = vmul.f32 %v269_v62, %v1108_v41  ;;  %708 = vmatpush.msra.mxu3 %v923_v1 }
  0xb3   :  { %v282_v42 = vadd.f32 0.112945676, %v281_v39  ;;  %v307_v15 = vadd.f32 0.00028619796, %v306_v0  ;;  %v318_v20 = vadd.f32 0.001143296, %v317_v6  ;;  %710 = vmatpush.msra.mxu3 %v933_v5 }
  0xb4   :  { %v271_v18 = vadd.f32 0.05243302, %v270_v7 }
  0xb5   :  { %v283_v46 = vmul.f32 %v282_v42, %v1108_v41  ;;  %v308_v11 = vmul.f32 %v307_v15, %v1131_v16  ;;  %v319_v17 = vmul.f32 %v318_v20, %v1131_v16  ;;  %712 = vmatpush.msra.mxu3 %v947_v12 }
  0xb6   :  { %v272_v36 = vmul.f32 %v271_v18, %v1108_v41 }
  0xb7   :  { %v284_v51 = vadd.f32 0.4994258, %v283_v46  ;;  %v320_v26 = vadd.f32 0.014752088, %v319_v17  ;;  %v309_v27 = vadd.f32 0.0036580483, %v308_v11  ;;  %714 = vmatpush.msra.mxu3 %v964_v19 }
  0xb8   :  { %v273_v12 = vadd.f32 0.18741608, %v272_v36 }
  0xb9   :  { %v285_v58 = vmul.f32 %v284_v51, %v1108_v41  ;;  %v321_v34 = vmul.f32 %v320_v26, %v1131_v16  ;;  %v310_v5 = vmul.f32 %v309_v27, %v1131_v16  ;;  %716 = vmatpush.msra.mxu3 %v983_v30 }
  0xba   :  { %v274_v30 = vmul.f32 %v273_v12, %v1108_v41 }
  0xbb   :  { %v286_v1 = vadd.f32 1.0, %v285_v58  ;;  %v322_v57 = vadd.f32 0.112945676, %v321_v34  ;;  %718 = vmatpush.msra.mxu3 %v993_v35  ;;  %v311_v19 = vadd.f32 0.05243302, %v310_v5 }
  0xbc   :  { %v275_v59 = vadd.f32 1.1283791, %v274_v30 }
  0xbd   :  { %767 = vrcp.f32 %v286_v1  ;;  %v323_v48 = vmul.f32 %v322_v57, %v1131_v16  ;;  %720 = vmatpush.msra.mxu3 %v1010_v52  ;;  %v312_v35 = vmul.f32 %v311_v19, %v1131_v16  ;;  %v298_v43 = vand.u32 2147483648, %v286_v1 }
  0xbe   :  { %v296_v52 = vand.u32 2147483647, %v286_v1  ;;  %vm292_vm2 = vweird.f32 %v286_v1  ;;  %v276_v24 = vmul.f32 %v275_v59, %v1086_v9 }
  0xbf   :  { %v324_v61 = vadd.f32 0.4994258, %v323_v48  ;;  %722 = vmatpush.msra.mxu3 %v1024_v3  ;;  %v313_v8 = vadd.f32 0.18741608, %v312_v35  ;;  %v299_v3 = vor.u32 1.1754944e-38, %v298_v43 }
  0xc0   :  { %vm297_vm4 = vcmp.eq.f32.partialorder %v296_v52, 8.507059e+37 }
  0xc1   :  { %v325_v2 = vmul.f32 %v324_v61, %v1131_v16  ;;  %724 = vmatpush.msra.mxu3 %v1044_v21  ;;  %v314_v31 = vmul.f32 %v313_v8, %v1131_v16 }
  0xc3   :  { %v768_v10 = vpop.eup %767  ;;  %v326_v28 = vadd.f32 1.0, %v325_v2  ;;  %726 = vmatpush.msra.mxu3 %v1054_v29  ;;  %v315_v38 = vadd.f32 1.1283791, %v314_v31 }
  0xc4   :  { %v288_v13 = vmul.f32 %v768_v10, %v286_v1  ;;  %vm293_vm1 = vweird.f32 %v768_v10 }
  0xc5   :  { %769 = vrcp.f32 %v326_v28  ;;  %728 = vmatpush.msra.mxu3 %v1071_v47  ;;  %vm294_vm3 = vmor %vm292_vm2, %vm293_vm1  ;;  %v338_v29 = vand.u32 2147483648, %v326_v28  ;;  %v336_v53 = vand.u32 2147483647, %v326_v28  ;;  %v260_v47 = vmul.f32 0.5, %v1075_v54 }
  0xc6   :  { %v289_v32 = vsub.f32 1.0, %v288_v13  ;;  %vm332_vm6 = vweird.f32 %v326_v28  ;;  %v316_v55 = vmul.f32 %v315_v38, %v1119_v63  ;;  %v261_v54 = vmul.f32 0.5, %v1114_v60  ;;  %v766_v60 = vld [vmem:[%s1201_s4] ss:$0 sm:$0xff]  ;;  %s797_s4 = smov [#allocation2]  }
  0xc7   :  { %v339_v50 = vor.u32 1.1754944e-38, %v338_v29  ;;  %vm337_vm8 = vcmp.eq.f32.partialorder %v336_v53, 8.507059e+37  ;;  %26 = vst.msk [vmem:[#allocation2] sm:$0xff] %vm25_vm0, %v766_v60  ;;  %s746_s10 = sshll.u32 %s797_s4, 4  ;;  %s747_s10 = int_to_ptr.vmem [resolvable:$true] %s746_s10 }
  0xc8   :  { %v290_v4 = vmul.f32 %v768_v10, %v289_v32  ;;  %27 = vst.msk [vmem:[#allocation2 + $0x8] sm:$0xff] %vm25_vm0, %v766_v60 }
  0xca   :  { %v291_v22 = vadd.f32 %v768_v10, %v290_v4 }
  0xcb   :  { %v770_v23 = vpop.eup %769 }
  0xcc   :  { %v295_v25 = vsel %vm294_vm3, %v768_v10, %v291_v22  ;;  %v328_v33 = vmul.f32 %v770_v23, %v326_v28  ;;  %vm333_vm5 = vweird.f32 %v770_v23 }
  0xcd   :  { %v300_v21 = vsel %vm297_vm4, %v299_v3, %v295_v25  ;;  %vm334_vm7 = vmor %vm332_vm6, %vm333_vm5 }
  0xce   :  { %v301_v41 = vmul.f32 %v300_v21, %v276_v24  ;;  %v329_v44 = vsub.f32 1.0, %v328_v33  ;;  %v348_v10 = vld [vmem:[#allocation2] sm:$0xff] }
  0xcf   :  { %v349_v52 = vld [vmem:[#allocation2 + $0x8] sm:$0xff] }
  0xd0   :  { %v760_v37 = vclamps-f32 %v301_v41, 1.0  ;;  %v330_v40 = vmul.f32 %v770_v23, %v329_v44 }
  0xd2   :  { %v344_v45 = vadd.f32 1.0, %v760_v37  ;;  %v331_v49 = vadd.f32 %v770_v23, %v330_v40 }
  0xd4   :  { %v346_v9 = vmul.f32 %v344_v45, %v260_v47  ;;  %v335_v14 = vsel %vm334_vm7, %v770_v23, %v331_v49 }
  0xd5   :  { %v340_v62 = vsel %vm337_vm8, %v339_v50, %v335_v14 }
  0xd6   :  { %v398_v56 = vand.u32 4294901760, %v346_v9  ;;  %v341_v16 = vmul.f32 %v340_v62, %v316_v55 }
  0xd8   :  { %v399_v39 = vsub.f32 %v346_v9, %v398_v56  ;;  %512 = vmatmul.f32.vlgmr.msrb.gmra.mxu3 %v398_v56  ;;  %v761_v0 = vclamps-f32 %v341_v16, 1.0 }
  0xda   :  { %570 = vmatmul.f32.vlgmr.msra.gmra.mxu0 %v399_v39  ;;  %v400_v6 = vand.u32 4294901760, %v399_v39  ;;  %v345_v42 = vadd.f32 1.0, %v761_v0 }
  0xdc   :  { %614 = vmatmul.f32.vlgmr.msra.gmra.mxu1 %v400_v6  ;;  %v401_v7 = vsub.f32 %v399_v39, %v400_v6  ;;  %v347_v15 = vmul.f32 %v345_v42, %v261_v54 }
  0xde   :  { %v402_v20 = vand.u32 4294901760, %v401_v7  ;;  %v406_v46 = vand.u32 4294901760, %v347_v15 }
  0xe0   :  { %403 = vmatmul.f32.vlgmr.msrb.gmra.mxu2 %v402_v20  ;;  %516 = vmatmul.f32.gmra.mxu3 %v406_v46  ;;  %v407_v63 = vsub.f32 %v347_v15, %v406_v46 }
  0xe2   :  { %575 = vmatmul.f32.gmra.mxu0 %v407_v63  ;;  %v408_v11 = vand.u32 4294901760, %v407_v63 }
  0xe4   :  { %620 = vmatmul.f32.gmra.mxu1 %v408_v11  ;;  %v409_v17 = vsub.f32 %v407_v63, %v408_v11 }
  0xe6   :  { %v410_v51 = vand.u32 4294901760, %v409_v17 }
  0xe8   :  { %411 = vmatmul.f32.gmra.mxu2 %v410_v51  ;;  %730 = vmatmul.f32.vlgmr.msra.gmra.mxu3 %v398_v56 }
  0xf0   :  { %689 = vmatmul.f32.vlgmr.msra.gmra.mxu2 %v398_v56  ;;  %734 = vmatmul.f32.gmra.mxu3 %v406_v46 }
  0xf8   :  { %693 = vmatmul.f32.gmra.mxu2 %v406_v46 }
 0x157   :  { %v571_v34 = vpop.f32.mrf.mxu0 }
 0x159   :  { %v615_v57 = vpop.f32.mrf.mxu1 }
 0x15b   :  { %v513_v18 = vpop.f32.mrf.mxu3 }
 0x15f   :  { %v576_v2 = vpop.f32.mrf.mxu0 }
 0x161   :  { %v621_v35 = vpop.f32.mrf.mxu1 }
 0x163   :  { %v404_v26 = vpop.f32.mrf.mxu2  ;;  %v517_v58 = vpop.f32.mrf.mxu3 }
 0x164   :  { %v514_v27 = vadd.f32 %v513_v18, %v404_v26 }
 0x166   :  { %v572_v36 = vadd.f32 %v571_v34, %v514_v27 }
 0x168   :  { %v616_v48 = vadd.f32 %v615_v57, %v572_v36 }
 0x16b   :  { %v412_v1 = vpop.f32.mrf.mxu2  ;;  %v731_v12 = vpop.f32.mrf.mxu3 }
 0x16c   :  { %v518_v5 = vadd.f32 %v517_v58, %v412_v1 }
 0x16e   :  { %v577_v30 = vadd.f32 %v576_v2, %v518_v5 }
 0x170   :  { %v622_v32 = vadd.f32 %v621_v35, %v577_v30 }
 0x173   :  { %v690_v61 = vpop.f32.mrf.mxu2  ;;  %v735_v4 = vpop.f32.mrf.mxu3 }
 0x174   :  { %v691_v19 = vadd.f32 %v690_v61, %v616_v48 }
 0x176   :  { %v732_v13 = vadd.f32 %v731_v12, %v691_v19 }
 0x178   :  { %v738_v28 = vadd.f32 %v732_v13, %v348_v10 }
 0x17a   :  { %740 = vst.msk [vmem:[#allocation2] sm:$0xff] %vm25_vm0, %v738_v28 }
 0x17b   :  { %v694_v43 = vpop.f32.mrf.mxu2 }
 0x17c   :  { %v695_v59 = vadd.f32 %v694_v43, %v622_v32 }
 0x17e   :  { %v736_v8 = vadd.f32 %v735_v4, %v695_v59 }
 0x180   :  { %v739_v22 = vadd.f32 %v736_v8, %v349_v52 }
 0x182   :  { %741 = vst.msk [vmem:[#allocation2 + $0x8] sm:$0xff] %vm25_vm0, %v739_v22 }
 0x183   :  { %754 = dma.vmem_to_hbm [thread:$0]  %s747_s10, 256, %s749_s13, [#allocation3], %s798_s14, %s798_s14, %s799_s15  }
 0x184   :  { %795 = dma.done.wait [#allocation3], 256  }
 0x185   :  { %796 = vsyncadd [#allocation3], 4294967040 }
 0x186   :  { %759 = vsyncpa [#allocation3], 1 }

</bundles_post_ra>
